<compile_context>
chip_gen: v7x
topology: tpu7x:2x2x1
jax: 0.10.0
libtpu: 0.0.40
codegen_flags: <defaults>
</compile_context>

<pallas_src>
import jax
import jax.numpy as jnp
from jax.experimental import pallas as pl
from jax.experimental.pallas import tpu as pltpu  # noqa: F401  (TPU backend)

_LANE = 128
_EPS = 1e-5


def _round_up(n, m):
    return ((n + m - 1) // m) * m


def _mlp_encoder_kernel(x_ref, w1_ref, p1_ref, w2_ref, p2_ref, w3_ref, b3_ref,
                        o_ref):
    """Fused Linear->BN->PReLU x2 -> Linear.

    p*_ref layout (packed per layer, [4, out_pad] f32):
      row 0: linear bias, row 1: BN gamma, row 2: BN beta, row 3: PReLU slope.
    Weights arrive as bf16 (storage/DMA); matmuls accumulate in f32.
    """

    def linear_bn_prelu(h_in, w_ref, p_ref):
        p = p_ref[...]                                   # (4, out_pad) f32
        bias, gamma, beta, slope = p[0:1], p[1:2], p[2:3], p[3:4]

        h = jnp.dot(h_in, w_ref[...].astype(jnp.float32),
                    preferred_element_type=jnp.float32) + bias

        # Training-mode BatchNorm1d (batch mean, biased batch variance),
        # fused affine: one scale + one shift per element.
        mu = jnp.mean(h, axis=0, keepdims=True)
        d = h - mu
        var = jnp.mean(d * d, axis=0, keepdims=True)
        scale = gamma * jax.lax.rsqrt(var + _EPS)
        shift = beta - mu * scale
        hn = h * scale + shift

        # PReLU (slope pre-broadcast along the feature axis).
        return jnp.where(hn > 0, hn, slope * hn)

    h = linear_bn_prelu(x_ref[...], w1_ref, p1_ref)
    h = linear_bn_prelu(h, w2_ref, p2_ref)
    out = jnp.dot(h, w3_ref[...].astype(jnp.float32),
                  preferred_element_type=jnp.float32) + b3_ref[...]
    o_ref[...] = out.astype(o_ref.dtype)


def pack_params(params, weights_dtype=jnp.bfloat16):
    """One-time layout prep (outside the hot path).

    Pads feature dims to multiples of 128 (lane-dense), packs the per-layer
    (bias, gamma, beta, prelu slope) into one [4, out_pad] block, and stores the
    Linear weights in `weights_dtype` (bf16 by default: halves weight DMA bytes;
    pass jnp.float32 for bit-exact f32 weight semantics).
    """
    in_dim, out_dim = params["w1"].shape
    in_pad = _round_up(in_dim, _LANE)
    out_pad = _round_up(out_dim, _LANE)
    f32 = jnp.float32

    def pad_w(w, rows, cols):
        wp = jnp.zeros((rows, cols), f32)
        wp = wp.at[: w.shape[0], : w.shape[1]].set(w.astype(f32))
        return wp.astype(weights_dtype)

    def pack_layer(b, g, bt, a):
        p = jnp.zeros((4, out_pad), f32)
        p = p.at[0, :out_dim].set(b.reshape(-1).astype(f32))
        p = p.at[1, :out_dim].set(g.reshape(-1).astype(f32))
        p = p.at[2, :out_dim].set(bt.reshape(-1).astype(f32))
        p = p.at[3, :out_dim].set(
            jnp.broadcast_to(a.reshape(-1).astype(f32), (out_dim,)))
        return p

    b3 = jnp.zeros((1, out_pad), f32)
    b3 = b3.at[0, :out_dim].set(params["b3"].reshape(-1).astype(f32))

    return {
        "out_dim": out_dim,
        "w1": pad_w(params["w1"], in_pad, out_pad),
        "w2": pad_w(params["w2"], out_pad, out_pad),
        "w3": pad_w(params["w3"], out_pad, out_pad),
        "p1": pack_layer(params["b1"], params["g1"], params["bt1"], params["a1"]),
        "p2": pack_layer(params["b2"], params["g2"], params["bt2"], params["a2"]),
        "b3": b3,
    }


def mlp_encoder_forward(x, packed, edge_index=None):
    """x: [N, in_dim] f32, packed: output of pack_params.

    `edge_index` is accepted-and-ignored, mirroring MLPEncoder.forward.
    """
    del edge_index  # unused by the PyTorch forward
    N, in_dim = x.shape
    in_pad, out_pad = packed["w1"].shape
    out_dim = packed["out_dim"]

    # Lane-dense input slab (zero-padded feature columns are exact no-ops).
    x_p = jnp.zeros((N, in_pad), jnp.float32).at[:, :in_dim].set(
        x.astype(jnp.float32))

    operands = (x_p, packed["w1"], packed["p1"], packed["w2"], packed["p2"],
                packed["w3"], packed["b3"])
    in_specs = [pl.BlockSpec(a.shape, lambda i: (0, 0)) for a in operands]

    out_p = pl.pallas_call(
        _mlp_encoder_kernel,
        out_shape=jax.ShapeDtypeStruct((N, out_pad), jnp.float32),
        grid=(1,),
        in_specs=in_specs,
        out_specs=pl.BlockSpec((N, out_pad), lambda i: (0, 0)),
    )(*operands)

    # TODO(synk): for large N, switch to a two-pass row-tiled grid (stats pass +
    # apply pass) since training-mode BN needs global batch statistics.
    return out_p[:, :out_dim]


def init_params(key, in_dim, out_dim):
    """Deterministic synthetic parameters matching MLPEncoder's shapes.

    Linear weights stored pre-transposed as [in, out]. BN: gamma=1, beta=0.
    PReLU: single shared parameter a=0.25 (per-channel also supported).
    """
    ks = jax.random.split(key, 6)
    s1 = 1.0 / jnp.sqrt(in_dim)
    s2 = 1.0 / jnp.sqrt(out_dim)
    return {
        "w1": jax.random.uniform(ks[0], (in_dim, out_dim), jnp.float32, -s1, s1),
        "b1": jax.random.uniform(ks[1], (out_dim,), jnp.float32, -s1, s1),
        "g1": jnp.ones((out_dim,), jnp.float32),
        "bt1": jnp.zeros((out_dim,), jnp.float32),
        "a1": jnp.full((1,), 0.25, jnp.float32),
        "w2": jax.random.uniform(ks[2], (out_dim, out_dim), jnp.float32, -s2, s2),
        "b2": jax.random.uniform(ks[3], (out_dim,), jnp.float32, -s2, s2),
        "g2": jnp.ones((out_dim,), jnp.float32),
        "bt2": jnp.zeros((out_dim,), jnp.float32),
        "a2": jnp.full((1,), 0.25, jnp.float32),
        "w3": jax.random.uniform(ks[4], (out_dim, out_dim), jnp.float32, -s2, s2),
        "b3": jax.random.uniform(ks[5], (out_dim,), jnp.float32, -s2, s2),
    }


def mlp_encoder_reference(x, p, weights_dtype=jnp.bfloat16):
    """Pure-JAX reference of the PyTorch forward (train-mode BN, eps=1e-5).

    Weights are rounded through `weights_dtype` to mirror the kernel's bf16
    weight storage (the only deviation from pure-f32 module semantics).
    """
    f32 = jnp.float32

    def wcast(w):
        return w.astype(weights_dtype).astype(f32)

    def bn_prelu(h, g, bt, a):
        mu = h.mean(0, keepdims=True)
        var = ((h - mu) ** 2).mean(0, keepdims=True)
        hn = (h - mu) / jnp.sqrt(var + _EPS) * g + bt
        return jnp.where(hn > 0, hn, a.reshape(-1) * hn)

    h = x @ wcast(p["w1"]) + p["b1"]
    h = bn_prelu(h, p["g1"], p["bt1"], p["a1"])
    h = h @ wcast(p["w2"]) + p["b2"]
    h = bn_prelu(h, p["g2"], p["bt2"], p["a2"])
    return h @ wcast(p["w3"]) + p["b3"]


if __name__ == "__main__":
    key = jax.random.PRNGKey(0)
    kx, kp = jax.random.split(key)

    N, in_dim, out_dim = 64, 16, 32
    x = jax.random.normal(kx, (N, in_dim), jnp.float32)
    params = init_params(kp, in_dim, out_dim)

    packed = pack_params(params, weights_dtype=jnp.bfloat16)
    out = mlp_encoder_forward(x, packed)  # edge_index unused by the module
    out = jax.block_until_ready(out)

    ref = mlp_encoder_reference(x, params, weights_dtype=jnp.bfloat16)
    assert out.shape == (N, out_dim)
    assert jnp.allclose(out, ref, atol=1e-4, rtol=1e-4), "mismatch vs reference"

    print("KERNEL_OK")
</pallas_src>

<mosaic_0001>
module attributes {stable_mosaic.version = 11 : i64} {
  func.func @_mlp_encoder_kernel(%arg0: i32, %arg1: memref<64x128xf32, #tpu.memory_space<vmem>>, %arg2: memref<128x128xbf16, #tpu.memory_space<vmem>>, %arg3: memref<4x128xf32, #tpu.memory_space<vmem>>, %arg4: memref<128x128xbf16, #tpu.memory_space<vmem>>, %arg5: memref<4x128xf32, #tpu.memory_space<vmem>>, %arg6: memref<128x128xbf16, #tpu.memory_space<vmem>>, %arg7: memref<1x128xf32, #tpu.memory_space<vmem>>, %arg8: memref<64x128xf32, #tpu.memory_space<vmem>>) attributes {dimension_semantics = [#tpu.dimension_semantics<arbitrary>], iteration_bounds = array<i64: 1>, scalar_prefetch = 0 : i64, scratch_operands = 0 : i64, tpu.core_type = #tpu.core_type<tc>, window_params = [{pipeline_mode = #tpu.pipeline_mode<synchronous>, transform_indices = @transform_0, window_bounds = array<i64: 64, 128>}, {pipeline_mode = #tpu.pipeline_mode<synchronous>, transform_indices = @transform_1, window_bounds = array<i64: 128, 128>}, {pipeline_mode = #tpu.pipeline_mode<synchronous>, transform_indices = @transform_2, window_bounds = array<i64: 4, 128>}, {pipeline_mode = #tpu.pipeline_mode<synchronous>, transform_indices = @transform_3, window_bounds = array<i64: 128, 128>}, {pipeline_mode = #tpu.pipeline_mode<synchronous>, transform_indices = @transform_4, window_bounds = array<i64: 4, 128>}, {pipeline_mode = #tpu.pipeline_mode<synchronous>, transform_indices = @transform_5, window_bounds = array<i64: 128, 128>}, {pipeline_mode = #tpu.pipeline_mode<synchronous>, transform_indices = @transform_6, window_bounds = array<i64: 1, 128>}, {pipeline_mode = #tpu.pipeline_mode<synchronous>, transform_indices = @transform_7, window_bounds = array<i64: 64, 128>}]} {
    %c0 = arith.constant 0 : index
    %c0_0 = arith.constant 0 : index
    %0 = vector.load %arg1[%c0, %c0_0] : memref<64x128xf32, #tpu.memory_space<vmem>>, vector<64x128xf32>
    %c0_1 = arith.constant 0 : index
    %c0_2 = arith.constant 0 : index
    %1 = vector.load %arg3[%c0_1, %c0_2] : memref<4x128xf32, #tpu.memory_space<vmem>>, vector<4x128xf32>
    %2 = vector.extract_strided_slice %1 {offsets = [0, 0], sizes = [1, 128], strides = [1, 1]} : vector<4x128xf32> to vector<1x128xf32>
    %3 = vector.extract_strided_slice %1 {offsets = [1, 0], sizes = [1, 128], strides = [1, 1]} : vector<4x128xf32> to vector<1x128xf32>
    %4 = vector.extract_strided_slice %1 {offsets = [2, 0], sizes = [1, 128], strides = [1, 1]} : vector<4x128xf32> to vector<1x128xf32>
    %5 = vector.extract_strided_slice %1 {offsets = [3, 0], sizes = [1, 128], strides = [1, 1]} : vector<4x128xf32> to vector<1x128xf32>
    %c0_3 = arith.constant 0 : index
    %c0_4 = arith.constant 0 : index
    %6 = vector.load %arg2[%c0_3, %c0_4] : memref<128x128xbf16, #tpu.memory_space<vmem>>, vector<128x128xbf16>
    %7 = arith.extf %6 : vector<128x128xbf16> to vector<128x128xf32>
    %cst = arith.constant dense<0.000000e+00> : vector<64x128xf32>
    %8 = tpu.matmul %0, %7, %cst {dimension_numbers = #tpu.dot_dimension_numbers<[1], [0], [0], [1], [0, 0, 1, 1], [], []>} : vector<64x128xf32>, vector<128x128xf32>, vector<64x128xf32> -> vector<64x128xf32>
    %9 = vector.broadcast %2 : vector<1x128xf32> to vector<64x128xf32>
    %10 = arith.addf %8, %9 : vector<64x128xf32>
    %cst_5 = arith.constant dense<0.000000e+00> : vector<128xf32>
    %11 = vector.multi_reduction <add>, %10, %cst_5 [0] : vector<64x128xf32> to vector<128xf32>
    %12 = vector.shape_cast %11 : vector<128xf32> to vector<1x128xf32>
    %cst_6 = arith.constant 6.400000e+01 : f32
    %13 = vector.broadcast %cst_6 : f32 to vector<1x128xf32>
    %14 = arith.divf %12, %13 : vector<1x128xf32>
    %15 = vector.broadcast %14 : vector<1x128xf32> to vector<64x128xf32>
    %16 = arith.subf %10, %15 : vector<64x128xf32>
    %17 = arith.mulf %16, %16 : vector<64x128xf32>
    %cst_7 = arith.constant dense<0.000000e+00> : vector<128xf32>
    %18 = vector.multi_reduction <add>, %17, %cst_7 [0] : vector<64x128xf32> to vector<128xf32>
    %19 = vector.shape_cast %18 : vector<128xf32> to vector<1x128xf32>
    %cst_8 = arith.constant 6.400000e+01 : f32
    %20 = vector.broadcast %cst_8 : f32 to vector<1x128xf32>
    %21 = arith.divf %19, %20 : vector<1x128xf32>
    %cst_9 = arith.constant 9.99999974E-6 : f32
    %22 = vector.broadcast %cst_9 : f32 to vector<1x128xf32>
    %23 = arith.addf %21, %22 : vector<1x128xf32>
    %24 = math.rsqrt %23 : vector<1x128xf32>
    %25 = arith.mulf %3, %24 : vector<1x128xf32>
    %26 = arith.mulf %14, %25 : vector<1x128xf32>
    %27 = arith.subf %4, %26 : vector<1x128xf32>
    %28 = vector.broadcast %25 : vector<1x128xf32> to vector<64x128xf32>
    %29 = arith.mulf %10, %28 : vector<64x128xf32>
    %30 = vector.broadcast %27 : vector<1x128xf32> to vector<64x128xf32>
    %31 = arith.addf %29, %30 : vector<64x128xf32>
    %cst_10 = arith.constant 0.000000e+00 : f32
    %32 = vector.broadcast %cst_10 : f32 to vector<64x128xf32>
    %33 = arith.cmpf ogt, %31, %32 : vector<64x128xf32>
    %34 = vector.broadcast %5 : vector<1x128xf32> to vector<64x128xf32>
    %35 = arith.mulf %34, %31 : vector<64x128xf32>
    %36 = arith.select %33, %31, %35 : vector<64x128xi1>, vector<64x128xf32>
    %c0_11 = arith.constant 0 : index
    %c0_12 = arith.constant 0 : index
    %37 = vector.load %arg5[%c0_11, %c0_12] : memref<4x128xf32, #tpu.memory_space<vmem>>, vector<4x128xf32>
    %38 = vector.extract_strided_slice %37 {offsets = [0, 0], sizes = [1, 128], strides = [1, 1]} : vector<4x128xf32> to vector<1x128xf32>
    %39 = vector.extract_strided_slice %37 {offsets = [1, 0], sizes = [1, 128], strides = [1, 1]} : vector<4x128xf32> to vector<1x128xf32>
    %40 = vector.extract_strided_slice %37 {offsets = [2, 0], sizes = [1, 128], strides = [1, 1]} : vector<4x128xf32> to vector<1x128xf32>
    %41 = vector.extract_strided_slice %37 {offsets = [3, 0], sizes = [1, 128], strides = [1, 1]} : vector<4x128xf32> to vector<1x128xf32>
    %c0_13 = arith.constant 0 : index
    %c0_14 = arith.constant 0 : index
    %42 = vector.load %arg4[%c0_13, %c0_14] : memref<128x128xbf16, #tpu.memory_space<vmem>>, vector<128x128xbf16>
    %43 = arith.extf %42 : vector<128x128xbf16> to vector<128x128xf32>
    %cst_15 = arith.constant dense<0.000000e+00> : vector<64x128xf32>
    %44 = tpu.matmul %36, %43, %cst_15 {dimension_numbers = #tpu.dot_dimension_numbers<[1], [0], [0], [1], [0, 0, 1, 1], [], []>} : vector<64x128xf32>, vector<128x128xf32>, vector<64x128xf32> -> vector<64x128xf32>
    %45 = vector.broadcast %38 : vector<1x128xf32> to vector<64x128xf32>
    %46 = arith.addf %44, %45 : vector<64x128xf32>
    %cst_16 = arith.constant dense<0.000000e+00> : vector<128xf32>
    %47 = vector.multi_reduction <add>, %46, %cst_16 [0] : vector<64x128xf32> to vector<128xf32>
    %48 = vector.shape_cast %47 : vector<128xf32> to vector<1x128xf32>
    %cst_17 = arith.constant 6.400000e+01 : f32
    %49 = vector.broadcast %cst_17 : f32 to vector<1x128xf32>
    %50 = arith.divf %48, %49 : vector<1x128xf32>
    %51 = vector.broadcast %50 : vector<1x128xf32> to vector<64x128xf32>
    %52 = arith.subf %46, %51 : vector<64x128xf32>
    %53 = arith.mulf %52, %52 : vector<64x128xf32>
    %cst_18 = arith.constant dense<0.000000e+00> : vector<128xf32>
    %54 = vector.multi_reduction <add>, %53, %cst_18 [0] : vector<64x128xf32> to vector<128xf32>
    %55 = vector.shape_cast %54 : vector<128xf32> to vector<1x128xf32>
    %cst_19 = arith.constant 6.400000e+01 : f32
    %56 = vector.broadcast %cst_19 : f32 to vector<1x128xf32>
    %57 = arith.divf %55, %56 : vector<1x128xf32>
    %cst_20 = arith.constant 9.99999974E-6 : f32
    %58 = vector.broadcast %cst_20 : f32 to vector<1x128xf32>
    %59 = arith.addf %57, %58 : vector<1x128xf32>
    %60 = math.rsqrt %59 : vector<1x128xf32>
    %61 = arith.mulf %39, %60 : vector<1x128xf32>
    %62 = arith.mulf %50, %61 : vector<1x128xf32>
    %63 = arith.subf %40, %62 : vector<1x128xf32>
    %64 = vector.broadcast %61 : vector<1x128xf32> to vector<64x128xf32>
    %65 = arith.mulf %46, %64 : vector<64x128xf32>
    %66 = vector.broadcast %63 : vector<1x128xf32> to vector<64x128xf32>
    %67 = arith.addf %65, %66 : vector<64x128xf32>
    %cst_21 = arith.constant 0.000000e+00 : f32
    %68 = vector.broadcast %cst_21 : f32 to vector<64x128xf32>
    %69 = arith.cmpf ogt, %67, %68 : vector<64x128xf32>
    %70 = vector.broadcast %41 : vector<1x128xf32> to vector<64x128xf32>
    %71 = arith.mulf %70, %67 : vector<64x128xf32>
    %72 = arith.select %69, %67, %71 : vector<64x128xi1>, vector<64x128xf32>
    %c0_22 = arith.constant 0 : index
    %c0_23 = arith.constant 0 : index
    %73 = vector.load %arg6[%c0_22, %c0_23] : memref<128x128xbf16, #tpu.memory_space<vmem>>, vector<128x128xbf16>
    %74 = arith.extf %73 : vector<128x128xbf16> to vector<128x128xf32>
    %cst_24 = arith.constant dense<0.000000e+00> : vector<64x128xf32>
    %75 = tpu.matmul %72, %74, %cst_24 {dimension_numbers = #tpu.dot_dimension_numbers<[1], [0], [0], [1], [0, 0, 1, 1], [], []>} : vector<64x128xf32>, vector<128x128xf32>, vector<64x128xf32> -> vector<64x128xf32>
    %c0_25 = arith.constant 0 : index
    %c0_26 = arith.constant 0 : index
    %76 = vector.load %arg7[%c0_25, %c0_26] : memref<1x128xf32, #tpu.memory_space<vmem>>, vector<1x128xf32>
    %77 = vector.broadcast %76 : vector<1x128xf32> to vector<64x128xf32>
    %78 = arith.addf %75, %77 : vector<64x128xf32>
    %c0_27 = arith.constant 0 : index
    %c0_28 = arith.constant 0 : index
    %79 = vector.load %arg8[%c0_27, %c0_28] : memref<64x128xf32, #tpu.memory_space<vmem>>, vector<64x128xf32>
    tpu.vector_store %arg8[%c0_27, %c0_28], %78 {strides = array<i32>} : memref<64x128xf32, #tpu.memory_space<vmem>>, vector<64x128xf32>,
    return
  }
  func.func @transform_0(%arg0: i32) -> (i32, i32) {
    %c0_i32 = arith.constant 0 : i32
    %c0_i32_0 = arith.constant 0 : i32
    %c0_i32_1 = arith.constant 0 : i32
    return %c0_i32, %c0_i32_0 : i32, i32
  }
  func.func @transform_1(%arg0: i32) -> (i32, i32) {
    %c0_i32 = arith.constant 0 : i32
    %c0_i32_0 = arith.constant 0 : i32
    %c0_i32_1 = arith.constant 0 : i32
    return %c0_i32, %c0_i32_0 : i32, i32
  }
  func.func @transform_2(%arg0: i32) -> (i32, i32) {
    %c0_i32 = arith.constant 0 : i32
    %c0_i32_0 = arith.constant 0 : i32
    %c0_i32_1 = arith.constant 0 : i32
    return %c0_i32, %c0_i32_0 : i32, i32
  }
  func.func @transform_3(%arg0: i32) -> (i32, i32) {
    %c0_i32 = arith.constant 0 : i32
    %c0_i32_0 = arith.constant 0 : i32
    %c0_i32_1 = arith.constant 0 : i32
    return %c0_i32, %c0_i32_0 : i32, i32
  }
  func.func @transform_4(%arg0: i32) -> (i32, i32) {
    %c0_i32 = arith.constant 0 : i32
    %c0_i32_0 = arith.constant 0 : i32
    %c0_i32_1 = arith.constant 0 : i32
    return %c0_i32, %c0_i32_0 : i32, i32
  }
  func.func @transform_5(%arg0: i32) -> (i32, i32) {
    %c0_i32 = arith.constant 0 : i32
    %c0_i32_0 = arith.constant 0 : i32
    %c0_i32_1 = arith.constant 0 : i32
    return %c0_i32, %c0_i32_0 : i32, i32
  }
  func.func @transform_6(%arg0: i32) -> (i32, i32) {
    %c0_i32 = arith.constant 0 : i32
    %c0_i32_0 = arith.constant 0 : i32
    %c0_i32_1 = arith.constant 0 : i32
    return %c0_i32, %c0_i32_0 : i32, i32
  }
  func.func @transform_7(%arg0: i32) -> (i32, i32) {
    %c0_i32 = arith.constant 0 : i32
    %c0_i32_0 = arith.constant 0 : i32
    %c0_i32_1 = arith.constant 0 : i32
    return %c0_i32, %c0_i32_0 : i32, i32
  }
}

</mosaic_0001>

<bundles_post_ra>
// kernel: tpu_custom_call.1
= control target key start
LH: loop header
LB: loop body
LE: loop exit
PB: predicated region body
PF: predicated region fallthrough
CT: control target
= control target key end

     0   :  { %12 = vsyncpa [#allocation3], 0  ;;  %s1553_s0 = inlined_call_operand.hbm [shape: f32[64,128], index: 0, kind: input, shape index: {}]   ;;  %s1554_s1 = inlined_call_operand.hbm [shape: bf16[128,128], index: 1, kind: input, shape index: {}]   ;;  %s1555_s2 = inlined_call_operand.vmem [shape: f32[4,128], index: 2, kind: input, shape index: {}]   ;;  %s1556_s3 = inlined_call_operand.hbm [shape: bf16[128,128], index: 3, kind: input, shape index: {}]   ;;  %s1557_s4 = inlined_call_operand.vmem [shape: f32[4,128], index: 4, kind: input, shape index: {}]   ;;  %s1558_s5 = inlined_call_operand.hbm [shape: bf16[128,128], index: 5, kind: input, shape index: {}]   ;;  %s1559_s6 = inlined_call_operand.vmem [shape: f32[1,128], index: 6, kind: input, shape index: {}]   ;;  %s1560_s7 = inlined_call_operand.hbm [shape: f32[64,128], index: 7, kind: output, shape index: {}]  }
   0x1   :  { %13 = vsyncpa [#allocation6], 0 }
   0x2   :  { %14 = vsyncpa [#allocation9], 0 }
   0x3   :  { %15 = vsyncpa [#allocation4], 0  ;;  %s1319_s24 = smov [#allocation5]   ;;  %s1201_s28 = scalar_lea.hbm %s1554_s1, 1024 }
   0x4   :  { %s33_s25 = sshll.u32 %s1319_s24, 4  ;;  %p1202_p0 = scmp.ne.s32.totalorder %s1554_s1, %s1201_s28  ;;  %s34_s25 = int_to_ptr.vmem [resolvable:$true] %s33_s25 }
   0x5   :  { %p1205_p1 = scmp.lt.u32.totalorder %s1201_s28, %s1554_s1 }
   0x7   :  { %p1207_p2 = pnand %p1205_p1, %p1202_p0 }
   0x9   :  { %1210 = shalt.err (!%p1207_p2)
}
   0xa   :  { %s1211_s10 = scalar_lea.vmem %s34_s25, 1024  ;;  %p1216_p4 = scmp.lt.s32.totalorder %s34_s25, %s34_s25 }
   0xb   :  { %p1212_p3 = scmp.ne.s32.totalorder %s34_s25, %s1211_s10  ;;  %p1217_p5 = scmp.lt.s32.totalorder %s1211_s10, %s1211_s10 }
   0xd   :  { %p1218_p6 = por %p1217_p5, %p1216_p4 }
   0xf   :  { %p1219_p7 = pnand %p1218_p6, %p1212_p3 }
  0x11   :  { %1222 = shalt.err (!%p1219_p7)
}
  0x12   :  { %s1320_s11 = smov 64   ;;  %s1321_s12 = smov 4  }
  0x13   :  { %39 = dma.hbm_to_vmem [thread:$0]  %s1554_s1, 1024, %s34_s25, [#allocation6], %s1320_s11, %s1320_s11, %s1321_s12  }
  0x14   :  { %s1322_s15 = smov [#allocation2]   ;;  %s1223_s19 = scalar_lea.hbm %s1553_s0, 1024 }
  0x15   :  { %s21_s16 = sshll.u32 %s1322_s15, 4  ;;  %p1224_p8 = scmp.ne.s32.totalorder %s1553_s0, %s1223_s19  ;;  %s22_s16 = int_to_ptr.vmem [resolvable:$true] %s21_s16 }
  0x16   :  { %p1227_p9 = scmp.lt.u32.totalorder %s1223_s19, %s1553_s0 }
  0x18   :  { %p1229_p10 = pnand %p1227_p9, %p1224_p8 }
  0x1a   :  { %1232 = shalt.err (!%p1229_p10)
}
  0x1b   :  { %s1233_s24 = scalar_lea.vmem %s22_s16, 1024  ;;  %p1238_p12 = scmp.lt.s32.totalorder %s22_s16, %s22_s16 }
  0x1c   :  { %p1234_p11 = scmp.ne.s32.totalorder %s22_s16, %s1233_s24  ;;  %p1239_p13 = scmp.lt.s32.totalorder %s1233_s24, %s1233_s24 }
  0x1e   :  { %p1240_p0 = por %p1239_p13, %p1238_p12 }
  0x20   :  { %p1241_p1 = pnand %p1240_p0, %p1234_p11 }
  0x22   :  { %1244 = shalt.err (!%p1241_p1)
}
  0x23   :  { %s1323_s1 = smov 128   ;;  %s1324_s25 = smov 8  }
  0x24   :  { %27 = dma.hbm_to_vmem [thread:$0]  %s1553_s0, 1024, %s22_s16, [#allocation3], %s1323_s1, %s1323_s1, %s1324_s25  }
  0x25   :  { %s1325_s28 = smov [#allocation7]   ;;  %s1326_s30 = smov [#allocation8]  }
  0x26   :  { %s47_s29 = sshll.u32 %s1325_s28, 4  ;;  %s61_s8 = sshll.u32 %s1326_s30, 4  ;;  %s48_s29 = int_to_ptr.vmem [resolvable:$true] %s47_s29  ;;  %s1398_s8 = int_to_ptr.vmem [resolvable:$true] %s61_s8 }
  0x27   :  { %s1245_s13 = scalar_lea.hbm %s1556_s3, 1024 }
  0x28   :  { %p1246_p2 = scmp.ne.s32.totalorder %s1556_s3, %s1245_s13  ;;  %p1249_p3 = scmp.lt.u32.totalorder %s1245_s13, %s1556_s3 }
  0x2a   :  { %p1251_p4 = pnand %p1249_p3, %p1246_p2 }
  0x2c   :  { %1254 = shalt.err (!%p1251_p4)
}
  0x2d   :  { %s1255_s0 = scalar_lea.vmem %s48_s29, 1024  ;;  %p1260_p6 = scmp.lt.s32.totalorder %s48_s29, %s48_s29 }
  0x2e   :  { %p1256_p5 = scmp.ne.s32.totalorder %s48_s29, %s1255_s0  ;;  %p1261_p7 = scmp.lt.s32.totalorder %s1255_s0, %s1255_s0 }
  0x30   :  { %p1262_p8 = por %p1261_p7, %p1260_p6 }
  0x32   :  { %p1263_p9 = pnand %p1262_p8, %p1256_p5 }
  0x34   :  { %1266 = shalt.err (!%p1263_p9)
}
  0x35   :  { %53 = dma.hbm_to_vmem [thread:$0]  %s1556_s3, 1024, %s48_s29, [#allocation6], %s1320_s11, %s1320_s11, %s1321_s12  }
  0x36   :  { %s1267_s22 = scalar_lea.hbm %s1558_s5, 1024 }
  0x37   :  { %p1268_p10 = scmp.ne.s32.totalorder %s1558_s5, %s1267_s22  ;;  %p1271_p11 = scmp.lt.u32.totalorder %s1267_s22, %s1558_s5 }
  0x39   :  { %p1273_p12 = pnand %p1271_p11, %p1268_p10 }
  0x3b   :  { %1276 = shalt.err (!%p1273_p12)
}
  0x3c   :  { %s1277_s28 = scalar_lea.vmem %s1398_s8, 1024  ;;  %p1282_p0 = scmp.lt.s32.totalorder %s1398_s8, %s1398_s8 }
  0x3d   :  { %p1278_p13 = scmp.ne.s32.totalorder %s1398_s8, %s1277_s28  ;;  %p1283_p1 = scmp.lt.s32.totalorder %s1277_s28, %s1277_s28 }
  0x3f   :  { %p1284_p2 = por %p1283_p1, %p1282_p0 }
  0x41   :  { %p1285_p3 = pnand %p1284_p2, %p1278_p13 }
  0x43   :  { %1288 = shalt.err (!%p1285_p3)
}
  0x44   :  { %67 = dma.hbm_to_vmem [thread:$0]  %s1558_s5, 1024, %s1398_s8, [#allocation9], %s1320_s11, %s1320_s11, %s1321_s12  }
  0x45   :  { %1311 = dma.done.wait [#allocation3], 1024  }
  0x46   :  { %1312 = vsyncadd [#allocation3], 4294966272 }
  0x47   :  { %1313 = dma.done.wait [#allocation6], 2048  }
  0x48   :  { %1314 = vsyncadd [#allocation6], 4294965248 }
  0x49   :  { %1315 = dma.done.wait [#allocation9], 1024  }
  0x4a   :  { %1316 = vsyncadd [#allocation9], 4294966272  ;;  %v756_v0 = vld [vmem:[#allocation5] sm:$0xff]   ;;  %v851_v1 = vld [vmem:[#allocation5 + $0x8] sm:$0xff]   ;;  %v123_v24 = vlaneseq  ;;  %s1327_s8 = smov [#allocation10]  }
  0x4b   :  { %1077 = vmatprep.subr.bf16.mxu0 %v756_v0  ;;  %v82_v2 = vld [vmem:[#allocation2] sm:$0xff]  ;;  %v852_v3 = vld [vmem:[#allocation5 + $0x10] sm:$0xff]   ;;  %v853_v4 = vld [vmem:[#allocation5 + $0x18] sm:$0xff]   ;;  %s740_s9 = sshll.u32 %s1327_s8, 4  ;;  %s741_s9 = int_to_ptr.vmem [resolvable:$true] %s740_s9 }
  0x4c   :  { %1079 = vmatpush3.bf16.msra.mxu0 %v756_v0  ;;  %976 = vmatprep.mubr.f32.mxu0 %v82_v2  ;;  %v854_v5 = vld [vmem:[#allocation5 + $0x20] sm:$0xff]   ;;  %v855_v6 = vld [vmem:[#allocation5 + $0x28] sm:$0xff]   ;;  %v856_v7 = vld [vmem:[#allocation5 + $0x30] sm:$0xff]   ;;  %v1435_v25 = vshrl.u32 %v123_v24, 7  ;;  %p1294_p5 = scmp.lt.s32.totalorder %s741_s9, %s741_s9 }
  0x4d   :  { %1081 = vmatprep.subr.bf16.mxu0 %v851_v1  ;;  %v857_v8 = vld [vmem:[#allocation5 + $0x38] sm:$0xff]   ;;  %v83_v9 = vld [vmem:[#allocation2 + $0x8] sm:$0xff]  ;;  %v84_v10 = vld [vmem:[#allocation2 + $0x10] sm:$0xff] }
  0x4e   :  { %v85_v11 = vld [vmem:[#allocation2 + $0x18] sm:$0xff]  ;;  %v86_v12 = vld [vmem:[#allocation2 + $0x20] sm:$0xff]  ;;  %v87_v13 = vld [vmem:[#allocation2 + $0x28] sm:$0xff]  ;;  %v125_v26 = vsub.s32 0, %v1435_v25 }
  0x4f   :  { %v88_v14 = vld [vmem:[#allocation2 + $0x30] sm:$0xff]  ;;  %v89_v15 = vld [vmem:[#allocation2 + $0x38] sm:$0xff]  ;;  %v788_v16 = vld [vmem:[#allocation7] sm:$0xff]  }
  0x50   :  { %1083 = vmatpush3.bf16.msra.mxu0 %v851_v1  ;;  %1109 = vmatprep.subr.bf16.mxu1 %v788_v16  ;;  %v858_v17 = vld [vmem:[#allocation7 + $0x8] sm:$0xff]   ;;  %v859_v18 = vld [vmem:[#allocation7 + $0x10] sm:$0xff]   ;;  %v860_v19 = vld [vmem:[#allocation7 + $0x18] sm:$0xff]  }
  0x51   :  { %1085 = vmatprep.subr.bf16.mxu0 %v852_v3  ;;  %1111 = vmatpush3.bf16.msra.mxu1 %v788_v16  ;;  %v861_v20 = vld [vmem:[#allocation7 + $0x20] sm:$0xff]   ;;  %v862_v21 = vld [vmem:[#allocation7 + $0x28] sm:$0xff]   ;;  %v863_v22 = vld [vmem:[#allocation7 + $0x30] sm:$0xff]  }
  0x52   :  { %1113 = vmatprep.subr.bf16.mxu1 %v858_v17  ;;  %v864_v23 = vld [vmem:[#allocation7 + $0x38] sm:$0xff]   ;;  %v1441_v27 = vld [vmem:[%s1555_s2] sm:$0xf] }
  0x53   :  { %v126_v28 = vrot.slane %v1441_v27, %v125_v26 }
  0x54   :  { %1087 = vmatpush3.bf16.msra.mxu0 %v852_v3 }
  0x55   :  { %1089 = vmatprep.subr.bf16.mxu0 %v853_v4  ;;  %1115 = vmatpush3.bf16.msra.mxu1 %v858_v17 }
  0x56   :  { %1117 = vmatprep.subr.bf16.mxu1 %v859_v18 }
  0x58   :  { %1091 = vmatpush3.bf16.msra.mxu0 %v853_v4 }
  0x59   :  { %1093 = vmatprep.subr.bf16.mxu0 %v854_v5  ;;  %1119 = vmatpush3.bf16.msra.mxu1 %v859_v18 }
  0x5a   :  { %1121 = vmatprep.subr.bf16.mxu1 %v860_v19 }
  0x5c   :  { %1095 = vmatpush3.bf16.msra.mxu0 %v854_v5 }
  0x5d   :  { %1097 = vmatprep.subr.bf16.mxu0 %v855_v6  ;;  %1123 = vmatpush3.bf16.msra.mxu1 %v860_v19 }
  0x5e   :  { %1125 = vmatprep.subr.bf16.mxu1 %v861_v20 }
  0x60   :  { %1099 = vmatpush3.bf16.msra.mxu0 %v855_v6 }
  0x61   :  { %1101 = vmatprep.subr.bf16.mxu0 %v856_v7  ;;  %1127 = vmatpush3.bf16.msra.mxu1 %v861_v20 }
  0x62   :  { %1129 = vmatprep.subr.bf16.mxu1 %v862_v21 }
  0x64   :  { %1103 = vmatpush3.bf16.msra.mxu0 %v856_v7 }
  0x65   :  { %1105 = vmatprep.subr.bf16.mxu0 %v857_v8  ;;  %1131 = vmatpush3.bf16.msra.mxu1 %v862_v21 }
  0x66   :  { %1133 = vmatprep.subr.bf16.mxu1 %v863_v22 }
  0x68   :  { %1107 = vmatpush3.bf16.msra.mxu0 %v857_v8 }
  0x69   :  { %1135 = vmatpush3.bf16.msra.mxu1 %v863_v22 }
  0x6a   :  { %1137 = vmatprep.subr.bf16.mxu1 %v864_v23 }
  0x6b   :  { %977 = vmatmul.mubr.f32.vlgmr.msra.gmra.mrb[0].mxu0 %v83_v9 }
  0x6c   :  { %979 = vmatprep.mubr.f32.mxu0 %v84_v10 }
  0x6d   :  { %1139 = vmatpush3.bf16.msra.mxu1 %v864_v23 }
  0x6f   :  { %980 = vmatmul.mubr.f32.gmra.mrb[2].mxu0 %v85_v11 }
  0x70   :  { %982 = vmatprep.mubr.f32.mxu0 %v86_v12 }
  0x73   :  { %983 = vmatmul.mubr.f32.gmra.mrb[4].mxu0 %v87_v13 }
  0x74   :  { %985 = vmatprep.mubr.f32.mxu0 %v88_v14 }
  0x77   :  { %986 = vmatmul.mubr.f32.gmra.mrb[6].mxu0 %v89_v15 }
 0x13e   :  { %v978_v29 = vpop.f32.mrb[0].mxu0 }
 0x13f   :  { %v193_v30 = vpop.f32.mrb[1].mxu0  ;;  %v1446_v31 = vadd.f32 %v978_v29, %v126_v28 }
 0x140   :  { %v1448_v32 = vadd.f32 %v193_v30, %v126_v28 }
 0x142   :  { %v981_v33 = vpop.f32.mrb[2].mxu0  ;;  %v232_v35 = vadd.f32 %v1446_v31, %v1448_v32 }
 0x143   :  { %v203_v34 = vpop.f32.mrb[3].mxu0  ;;  %v1454_v37 = vadd.f32 %v981_v33, %v126_v28  ;;  %v287_v33 = vsub.s32 1, %v1435_v25 }
 0x144   :  { %v1452_v36 = vadd.f32 %v203_v34, %v126_v28 }
 0x146   :  { %v233_v38 = vadd.f32 %v232_v35, %v1452_v36  ;;  %v984_v39 = vpop.f32.mrb[4].mxu0  ;;  %v319_v35 = vsub.s32 3, %v1435_v25 }
 0x147   :  { %v213_v40 = vpop.f32.mrb[5].mxu0  ;;  %v1460_v43 = vadd.f32 %v984_v39, %v126_v28 }
 0x148   :  { %v1457_v41 = vadd.f32 %v213_v40, %v126_v28  ;;  %v234_v42 = vadd.f32 %v233_v38, %v1454_v37  ;;  %v299_v40 = vsub.s32 2, %v1435_v25 }
 0x14a   :  { %v235_v44 = vadd.f32 %v234_v42, %v1457_v41  ;;  %v987_v45 = vpop.f32.mrb[6].mxu0 }
 0x14b   :  { %v223_v46 = vpop.f32.mrb[7].mxu0  ;;  %v1466_v49 = vadd.f32 %v987_v45, %v126_v28 }
 0x14c   :  { %v1463_v47 = vadd.f32 %v223_v46, %v126_v28  ;;  %v236_v48 = vadd.f32 %v235_v44, %v1460_v43  ;;  %v320_v44 = vrot.slane %v1441_v27, %v319_v35 }
 0x14e   :  { %v237_v50 = vadd.f32 %v236_v48, %v1463_v47 }
 0x150   :  { %v238_v51 = vadd.f32 %v237_v50, %v1466_v49 }
 0x152   :  { %v239_v52 = vrot.slane %v238_v51, 4 }
 0x154   :  { %v240_v53 = vadd.f32 %v239_v52, %v238_v51 }
 0x156   :  { %v241_v54 = vrot.slane %v240_v53, 2 }
 0x158   :  { %v242_v55 = vadd.f32 %v241_v54, %v240_v53 }
 0x15a   :  { %v243_v56 = vrot.slane %v242_v55, 1 }
 0x15c   :  { %v244_v57 = vadd.f32 %v243_v56, %v242_v55 }
 0x15e   :  { %v246_v58 = vmul.f32 0.015625, %v244_v57 }
 0x160   :  { %v247_v59 = vsub.f32 %v1448_v32, %v246_v58  ;;  %v248_v60 = vsub.f32 %v1446_v31, %v246_v58  ;;  %v249_v61 = vsub.f32 %v1452_v36, %v246_v58  ;;  %v250_v62 = vsub.f32 %v1454_v37, %v246_v58 }
 0x161   :  { %v251_v1 = vsub.f32 %v1457_v41, %v246_v58  ;;  %v252_v4 = vsub.f32 %v1460_v43, %v246_v58  ;;  %v253_v7 = vsub.f32 %v1463_v47, %v246_v58  ;;  %v254_v10 = vsub.f32 %v1466_v49, %v246_v58 }
 0x162   :  { %v255_v63 = vmul.f32 %v247_v59, %v247_v59  ;;  %v256_v0 = vmul.f32 %v248_v60, %v248_v60  ;;  %v257_v2 = vmul.f32 %v249_v61, %v249_v61  ;;  %v258_v5 = vmul.f32 %v250_v62, %v250_v62 }
 0x163   :  { %v259_v8 = vmul.f32 %v251_v1, %v251_v1  ;;  %v260_v11 = vmul.f32 %v252_v4, %v252_v4  ;;  %v261_v13 = vmul.f32 %v253_v7, %v253_v7  ;;  %v262_v15 = vmul.f32 %v254_v10, %v254_v10  ;;  %v867_v10 = vld [vmem:[#allocation8 + $0x18] sm:$0xff]  }
 0x164   :  { %v263_v3 = vadd.f32 %v256_v0, %v255_v63 }
 0x166   :  { %v264_v6 = vadd.f32 %v263_v3, %v257_v2 }
 0x168   :  { %v265_v9 = vadd.f32 %v264_v6, %v258_v5 }
 0x16a   :  { %v266_v12 = vadd.f32 %v265_v9, %v259_v8  ;;  %v820_v8 = vld [vmem:[#allocation8] sm:$0xff]   ;;  %v866_v9 = vld [vmem:[#allocation8 + $0x10] sm:$0xff]  }
 0x16b   :  { %1141 = vmatprep.subr.bf16.mxu0 %v820_v8  ;;  %1172 = vmatprep.subr.bf16.mxu1 %v820_v8 }
 0x16c   :  { %v267_v14 = vadd.f32 %v266_v12, %v260_v11  ;;  %1143 = vmatpush3.bf16.msra.mxu0 %v820_v8  ;;  %v868_v11 = vld [vmem:[#allocation8 + $0x20] sm:$0xff]   ;;  %v869_v12 = vld [vmem:[#allocation8 + $0x28] sm:$0xff]  }
 0x16e   :  { %v268_v16 = vadd.f32 %v267_v14, %v261_v13  ;;  %v870_v13 = vld [vmem:[#allocation8 + $0x30] sm:$0xff]   ;;  %v871_v14 = vld [vmem:[#allocation8 + $0x38] sm:$0xff]  }
 0x170   :  { %v269_v17 = vadd.f32 %v268_v16, %v262_v15  ;;  %v1501_v15 = vld [vmem:[%s1557_s4] sm:$0xf] }
 0x171   :  { %v373_v16 = vrot.slane %v1501_v15, %v125_v26 }
 0x172   :  { %v270_v18 = vrot.slane %v269_v17, 4 }
 0x174   :  { %v271_v19 = vadd.f32 %v270_v18, %v269_v17 }
 0x176   :  { %v272_v20 = vrot.slane %v271_v19, 2 }
 0x178   :  { %v273_v21 = vadd.f32 %v272_v20, %v271_v19 }
 0x17a   :  { %v274_v22 = vrot.slane %v273_v21, 1 }
 0x17c   :  { %v275_v23 = vadd.f32 %v274_v22, %v273_v21 }
 0x17e   :  { %v276_v24 = vmul.f32 0.015625, %v275_v23 }
 0x180   :  { %v277_v28 = vadd.f32 1e-05, %v276_v24 }
 0x182   :  { %1197 = vrsqrt.f32 %v277_v28 }
 0x18c   :  { %v1198_v29 = vpop.eup %1197 }
 0x18d   :  { %v279_v30 = vmul.f32 %v1198_v29, %v1441_v27 }
 0x18f   :  { %v280_v34 = vmul.f32 %v279_v30, %v246_v58  ;;  %v288_v39 = vrot.slane %v279_v30, %v287_v33 }
 0x191   :  { %v282_v38 = vrot.slane %v280_v34, 7  ;;  %v289_v46 = vmul.f32 %v288_v39, %v1448_v32  ;;  %v290_v48 = vmul.f32 %v288_v39, %v1446_v31  ;;  %v291_v50 = vmul.f32 %v288_v39, %v1452_v36 }
 0x192   :  { %v292_v51 = vmul.f32 %v288_v39, %v1454_v37  ;;  %v293_v52 = vmul.f32 %v288_v39, %v1457_v41  ;;  %v294_v32 = vmul.f32 %v288_v39, %v1460_v43  ;;  %v295_v31 = vmul.f32 %v288_v39, %v1463_v47 }
 0x193   :  { %v284_v42 = vsub.f32 %v1441_v27, %v282_v38  ;;  %v296_v0 = vmul.f32 %v288_v39, %v1466_v49  ;;  %v865_v49 = vld [vmem:[#allocation8 + $0x8] sm:$0xff]  }
 0x194   :  { %1145 = vmatprep.subr.bf16.mxu0 %v865_v49 }
 0x195   :  { %v300_v45 = vrot.slane %v284_v42, %v299_v40  ;;  %1147 = vmatpush3.bf16.msra.mxu0 %v865_v49 }
 0x196   :  { %1149 = vmatprep.subr.bf16.mxu0 %v866_v9 }
 0x197   :  { %v301_v53 = vadd.f32 %v300_v45, %v289_v46  ;;  %v302_v54 = vadd.f32 %v300_v45, %v290_v48  ;;  %v303_v55 = vadd.f32 %v300_v45, %v291_v50  ;;  %v304_v56 = vadd.f32 %v300_v45, %v292_v51 }
 0x198   :  { %v305_v57 = vadd.f32 %v300_v45, %v293_v52  ;;  %v306_v41 = vadd.f32 %v300_v45, %v294_v32  ;;  %v307_v63 = vadd.f32 %v300_v45, %v295_v31  ;;  %v308_v3 = vadd.f32 %v300_v45, %v296_v0 }
 0x199   :  { %vm309_vm0 = vcmp.gt.f32.partialorder %v301_v53, 0.0  ;;  %v321_v27 = vmul.f32 %v320_v44, %v301_v53  ;;  %vm310_vm1 = vcmp.gt.f32.partialorder %v302_v54, 0.0  ;;  %v322_v58 = vmul.f32 %v320_v44, %v302_v54  ;;  %1151 = vmatpush3.bf16.msra.mxu0 %v866_v9 }
 0x19a   :  { %vm311_vm2 = vcmp.gt.f32.partialorder %v303_v55, 0.0  ;;  %v323_v59 = vmul.f32 %v320_v44, %v303_v55  ;;  %v324_v37 = vmul.f32 %v320_v44, %v304_v56  ;;  %vm312_vm3 = vcmp.gt.f32.partialorder %v304_v56, 0.0  ;;  %1153 = vmatprep.subr.bf16.mxu0 %v867_v10 }
 0x19b   :  { %v329_v36 = vsel %vm309_vm0, %v301_v53, %v321_v27  ;;  %v330_v60 = vsel %vm310_vm1, %v302_v54, %v322_v58  ;;  %v325_v62 = vmul.f32 %v320_v44, %v305_v57  ;;  %vm313_vm4 = vcmp.gt.f32.partialorder %v305_v57, 0.0 }
 0x19c   :  { %1020 = vmatprep.mubr.f32.mxu1 %v329_v36  ;;  %v331_v61 = vsel %vm311_vm2, %v303_v55, %v323_v59  ;;  %v332_v1 = vsel %vm312_vm3, %v304_v56, %v324_v37  ;;  %v326_v2 = vmul.f32 %v320_v44, %v306_v41  ;;  %vm314_vm5 = vcmp.gt.f32.partialorder %v306_v41, 0.0 }
 0x19d   :  { %1021 = vmatmul.mubr.f32.vlgmr.msra.gmra.mrb[0].mxu1 %v330_v60  ;;  %v333_v43 = vsel %vm313_vm4, %v305_v57, %v325_v62  ;;  %v327_v47 = vmul.f32 %v320_v44, %v307_v63  ;;  %vm315_vm6 = vcmp.gt.f32.partialorder %v307_v63, 0.0  ;;  %v328_v5 = vmul.f32 %v320_v44, %v308_v3  ;;  %1155 = vmatpush3.bf16.msra.mxu0 %v867_v10 }
 0x19e   :  { %1023 = vmatprep.mubr.f32.mxu1 %v331_v61  ;;  %v334_v4 = vsel %vm314_vm5, %v306_v41, %v326_v2  ;;  %vm316_vm7 = vcmp.gt.f32.partialorder %v308_v3, 0.0  ;;  %1180 = vmatpush3.bf16.msra.mxu1 %v820_v8 }
 0x19f   :  { %v335_v6 = vsel %vm315_vm6, %v307_v63, %v327_v47  ;;  %v336_v7 = vsel %vm316_vm7, %v308_v3, %v328_v5  ;;  %1173 = vmatprep.subr.bf16.mxu1 %v865_v49  ;;  %1157 = vmatprep.subr.bf16.mxu0 %v868_v11 }
 0x1a1   :  { %1024 = vmatmul.mubr.f32.gmra.mrb[2].mxu1 %v332_v1  ;;  %1159 = vmatpush3.bf16.msra.mxu0 %v868_v11 }
 0x1a2   :  { %1026 = vmatprep.mubr.f32.mxu1 %v333_v43  ;;  %1181 = vmatpush3.bf16.msra.mxu1 %v865_v49 }
 0x1a3   :  { %1174 = vmatprep.subr.bf16.mxu1 %v866_v9  ;;  %1161 = vmatprep.subr.bf16.mxu0 %v869_v12 }
 0x1a5   :  { %1027 = vmatmul.mubr.f32.gmra.mrb[4].mxu1 %v334_v4  ;;  %1163 = vmatpush3.bf16.msra.mxu0 %v869_v12 }
 0x1a6   :  { %1029 = vmatprep.mubr.f32.mxu1 %v335_v6  ;;  %1182 = vmatpush3.bf16.msra.mxu1 %v866_v9 }
 0x1a7   :  { %1175 = vmatprep.subr.bf16.mxu1 %v867_v10  ;;  %1165 = vmatprep.subr.bf16.mxu0 %v870_v13 }
 0x1a9   :  { %1030 = vmatmul.mubr.f32.gmra.mrb[6].mxu1 %v336_v7  ;;  %1167 = vmatpush3.bf16.msra.mxu0 %v870_v13 }
 0x1aa   :  { %1183 = vmatpush3.bf16.msra.mxu1 %v867_v10  ;;  %1169 = vmatprep.subr.bf16.mxu0 %v871_v14 }
 0x1ab   :  { %1176 = vmatprep.subr.bf16.mxu1 %v868_v11 }
 0x1ad   :  { %1171 = vmatpush3.bf16.msra.mxu0 %v871_v14 }
 0x1ae   :  { %1184 = vmatpush3.bf16.msra.mxu1 %v868_v11 }
 0x1af   :  { %1177 = vmatprep.subr.bf16.mxu1 %v869_v12 }
 0x1b2   :  { %1185 = vmatpush3.bf16.msra.mxu1 %v869_v12 }
 0x1b3   :  { %1178 = vmatprep.subr.bf16.mxu1 %v870_v13 }
 0x1b6   :  { %1186 = vmatpush3.bf16.msra.mxu1 %v870_v13 }
 0x1b7   :  { %1179 = vmatprep.subr.bf16.mxu1 %v871_v14 }
 0x1ba   :  { %1187 = vmatpush3.bf16.msra.mxu1 %v871_v14 }
 0x270   :  { %v1022_v17 = vpop.f32.mrb[0].mxu1 }
 0x271   :  { %v440_v18 = vpop.f32.mrb[1].mxu1  ;;  %v1506_v19 = vadd.f32 %v1022_v17, %v373_v16 }
 0x272   :  { %v1508_v20 = vadd.f32 %v440_v18, %v373_v16 }
 0x274   :  { %v1025_v21 = vpop.f32.mrb[2].mxu1  ;;  %v479_v23 = vadd.f32 %v1506_v19, %v1508_v20 }
 0x275   :  { %v450_v22 = vpop.f32.mrb[3].mxu1  ;;  %v1514_v28 = vadd.f32 %v1025_v21, %v373_v16 }
 0x276   :  { %v1512_v24 = vadd.f32 %v450_v22, %v373_v16 }
 0x278   :  { %v480_v29 = vadd.f32 %v479_v23, %v1512_v24  ;;  %v1028_v30 = vpop.f32.mrb[4].mxu1 }
 0x279   :  { %v460_v34 = vpop.f32.mrb[5].mxu1  ;;  %v466_v39 = vadd.f32 %v1028_v30, %v373_v16 }
 0x27a   :  { %v461_v26 = vadd.f32 %v460_v34, %v373_v16  ;;  %v481_v38 = vadd.f32 %v480_v29, %v1514_v28 }
 0x27c   :  { %v482_v42 = vadd.f32 %v481_v38, %v461_v26  ;;  %v1031_v44 = vpop.f32.mrb[6].mxu1 }
 0x27d   :  { %v470_v45 = vpop.f32.mrb[7].mxu1  ;;  %v476_v50 = vadd.f32 %v1031_v44, %v373_v16 }
 0x27e   :  { %v471_v46 = vadd.f32 %v470_v45, %v373_v16  ;;  %v483_v48 = vadd.f32 %v482_v42, %v466_v39  ;;  %v566_v42 = vrot.slane %v1501_v15, %v319_v35 }
 0x280   :  { %v484_v51 = vadd.f32 %v483_v48, %v471_v46 }
 0x282   :  { %v485_v52 = vadd.f32 %v484_v51, %v476_v50 }
 0x284   :  { %v486_v53 = vrot.slane %v485_v52, 4 }
 0x286   :  { %v487_v54 = vadd.f32 %v486_v53, %v485_v52 }
 0x288   :  { %v488_v55 = vrot.slane %v487_v54, 2 }
 0x28a   :  { %v489_v56 = vadd.f32 %v488_v55, %v487_v54 }
 0x28c   :  { %v490_v57 = vrot.slane %v489_v56, 1 }
 0x28e   :  { %v491_v27 = vadd.f32 %v490_v57, %v489_v56 }
 0x290   :  { %v492_v58 = vmul.f32 0.015625, %v491_v27 }
 0x292   :  { %v493_v59 = vsub.f32 %v1508_v20, %v492_v58  ;;  %v494_v32 = vsub.f32 %v1506_v19, %v492_v58  ;;  %v495_v31 = vsub.f32 %v1512_v24, %v492_v58  ;;  %v496_v36 = vsub.f32 %v1514_v28, %v492_v58 }
 0x293   :  { %v497_v41 = vsub.f32 %v461_v26, %v492_v58  ;;  %v498_v63 = vsub.f32 %v466_v39, %v492_v58  ;;  %v499_v2 = vsub.f32 %v471_v46, %v492_v58  ;;  %v500_v47 = vsub.f32 %v476_v50, %v492_v58 }
 0x294   :  { %v501_v60 = vmul.f32 %v493_v59, %v493_v59  ;;  %v502_v37 = vmul.f32 %v494_v32, %v494_v32  ;;  %v503_v61 = vmul.f32 %v495_v31, %v495_v31  ;;  %v504_v0 = vmul.f32 %v496_v36, %v496_v36 }
 0x295   :  { %v505_v3 = vmul.f32 %v497_v41, %v497_v41  ;;  %v506_v4 = vmul.f32 %v498_v63, %v498_v63  ;;  %v507_v6 = vmul.f32 %v499_v2, %v499_v2  ;;  %v508_v8 = vmul.f32 %v500_v47, %v500_v47 }
 0x296   :  { %v509_v62 = vadd.f32 %v502_v37, %v501_v60 }
 0x298   :  { %v510_v1 = vadd.f32 %v509_v62, %v503_v61  ;;  %v754_v61 = vld [vmem:[%s1559_s6] ss:$0 sm:$0xff]  ;;  %s1289_s6 = scalar_lea.vmem %s741_s9, 1024 }
 0x299   :  { %p1290_p4 = scmp.ne.s32.totalorder %s741_s9, %s1289_s6  ;;  %p1295_p6 = scmp.lt.s32.totalorder %s1289_s6, %s1289_s6 }
 0x29a   :  { %v511_v43 = vadd.f32 %v510_v1, %v504_v0 }
 0x29b   :  { %p1296_p7 = por %p1295_p6, %p1294_p5 }
 0x29c   :  { %v512_v5 = vadd.f32 %v511_v43, %v505_v3 }
 0x29d   :  { %p1297_p8 = pnand %p1296_p7, %p1290_p4 }
 0x29e   :  { %v513_v7 = vadd.f32 %v512_v5, %v506_v4 }
 0x2a0   :  { %v514_v49 = vadd.f32 %v513_v7, %v507_v6 }
 0x2a2   :  { %v515_v9 = vadd.f32 %v514_v49, %v508_v8 }
 0x2a4   :  { %v516_v10 = vrot.slane %v515_v9, 4 }
 0x2a6   :  { %v517_v11 = vadd.f32 %v516_v10, %v515_v9 }
 0x2a8   :  { %v518_v12 = vrot.slane %v517_v11, 2 }
 0x2aa   :  { %v519_v13 = vadd.f32 %v518_v12, %v517_v11 }
 0x2ac   :  { %v520_v14 = vrot.slane %v519_v13, 1 }
 0x2ae   :  { %v521_v16 = vadd.f32 %v520_v14, %v519_v13 }
 0x2b0   :  { %v522_v17 = vmul.f32 0.015625, %v521_v16 }
 0x2b2   :  { %v523_v18 = vadd.f32 1e-05, %v522_v17 }
 0x2b4   :  { %1199 = vrsqrt.f32 %v523_v18 }
 0x2be   :  { %v1200_v21 = vpop.eup %1199 }
 0x2bf   :  { %v525_v22 = vmul.f32 %v1200_v21, %v1501_v15 }
 0x2c1   :  { %v526_v23 = vmul.f32 %v525_v22, %v492_v58  ;;  %v534_v29 = vrot.slane %v525_v22, %v287_v33 }
 0x2c3   :  { %v528_v30 = vrot.slane %v526_v23, 7  ;;  %v535_v38 = vmul.f32 %v534_v29, %v1508_v20  ;;  %v539_v45 = vmul.f32 %v534_v29, %v461_v26  ;;  %v536_v48 = vmul.f32 %v534_v29, %v1506_v19 }
 0x2c4   :  { %v540_v51 = vmul.f32 %v534_v29, %v466_v39  ;;  %v541_v52 = vmul.f32 %v534_v29, %v471_v46  ;;  %v537_v53 = vmul.f32 %v534_v29, %v1512_v24  ;;  %v538_v33 = vmul.f32 %v534_v29, %v1514_v28 }
 0x2c5   :  { %v530_v34 = vsub.f32 %v1501_v15, %v528_v30  ;;  %v542_v54 = vmul.f32 %v534_v29, %v476_v50 }
 0x2c7   :  { %v546_v44 = vrot.slane %v530_v34, %v299_v40 }
 0x2c9   :  { %v547_v55 = vadd.f32 %v546_v44, %v535_v38  ;;  %v551_v56 = vadd.f32 %v546_v44, %v539_v45  ;;  %v548_v20 = vadd.f32 %v546_v44, %v536_v48  ;;  %v552_v57 = vadd.f32 %v546_v44, %v540_v51 }
 0x2ca   :  { %v549_v27 = vadd.f32 %v546_v44, %v537_v53  ;;  %v553_v58 = vadd.f32 %v546_v44, %v541_v52  ;;  %v550_v35 = vadd.f32 %v546_v44, %v538_v33  ;;  %v554_v15 = vadd.f32 %v546_v44, %v542_v54 }
 0x2cb   :  { %vm555_vm8 = vcmp.gt.f32.partialorder %v547_v55, 0.0  ;;  %v567_v25 = vmul.f32 %v566_v42, %v547_v55  ;;  %vm559_vm9 = vcmp.gt.f32.partialorder %v551_v56, 0.0  ;;  %v571_v40 = vmul.f32 %v566_v42, %v551_v56 }
 0x2cc   :  { %vm556_vm10 = vcmp.gt.f32.partialorder %v548_v20, 0.0  ;;  %v568_v19 = vmul.f32 %v566_v42, %v548_v20  ;;  %vm560_vm11 = vcmp.gt.f32.partialorder %v552_v57, 0.0  ;;  %v572_v26 = vmul.f32 %v566_v42, %v552_v57 }
 0x2cd   :  { %v575_v24 = vsel %vm555_vm8, %v547_v55, %v567_v25  ;;  %v579_v39 = vsel %vm559_vm9, %v551_v56, %v571_v40  ;;  %vm557_vm12 = vcmp.gt.f32.partialorder %v549_v27, 0.0  ;;  %v569_v28 = vmul.f32 %v566_v42, %v549_v27 }
 0x2ce   :  { %1064 = vmatprep.mubr.f32.mxu0 %v575_v24  ;;  %1070 = vmatprep.mubr.f32.mxu1 %v579_v39  ;;  %v576_v46 = vsel %vm556_vm10, %v548_v20, %v568_v19  ;;  %v580_v50 = vsel %vm560_vm11, %v552_v57, %v572_v26  ;;  %vm561_vm13 = vcmp.gt.f32.partialorder %v553_v58, 0.0  ;;  %v573_v59 = vmul.f32 %v566_v42, %v553_v58 }
 0x2cf   :  { %1065 = vmatmul.mubr.f32.vlgmr.msra.gmra.mrb[8].mxu0 %v576_v46  ;;  %1071 = vmatmul.mubr.f32.vlgmr.msra.gmra.mrb[8].mxu1 %v580_v50  ;;  %v577_v32 = vsel %vm557_vm12, %v549_v27, %v569_v28  ;;  %vm558_vm14 = vcmp.gt.f32.partialorder %v550_v35, 0.0  ;;  %v570_v31 = vmul.f32 %v566_v42, %v550_v35  ;;  %vm562_vm15 = vcmp.gt.f32.partialorder %v554_v15, 0.0 }
 0x2d0   :  { %1067 = vmatprep.mubr.f32.mxu0 %v577_v32  ;;  %v581_v36 = vsel %vm561_vm13, %v553_v58, %v573_v59  ;;  %v574_v60 = vmul.f32 %v566_v42, %v554_v15 }
 0x2d1   :  { %1073 = vmatprep.mubr.f32.mxu1 %v581_v36  ;;  %v578_v37 = vsel %vm558_vm14, %v550_v35, %v570_v31 }
 0x2d2   :  { %v582_v41 = vsel %vm562_vm15, %v554_v15, %v574_v60 }
 0x2d3   :  { %1068 = vmatmul.mubr.f32.gmra.mrb[10].mxu0 %v578_v37  ;;  %1074 = vmatmul.mubr.f32.gmra.mrb[10].mxu1 %v582_v41 }
 0x3a2   :  { %v1066_v62 = vpop.f32.mrb[8].mxu0  ;;  %v1072_v63 = vpop.f32.mrb[8].mxu1 }
 0x3a3   :  { %v694_v0 = vadd.f32 %v1066_v62, %v754_v61  ;;  %v714_v1 = vadd.f32 %v1072_v63, %v754_v61  ;;  %v688_v2 = vpop.f32.mrb[9].mxu0  ;;  %v708_v3 = vpop.f32.mrb[9].mxu1 }
 0x3a4   :  { %v689_v43 = vadd.f32 %v754_v61, %v688_v2  ;;  %v709_v47 = vadd.f32 %v754_v61, %v708_v3 }
 0x3a5   :  { %728 = vst [vmem:[#allocation10 + $0x8] sm:$0xff] %v694_v0  ;;  %732 = vst [vmem:[#allocation10 + $0x28] sm:$0xff] %v714_v1 }
 0x3a6   :  { %727 = vst [vmem:[#allocation10] sm:$0xff] %v689_v43  ;;  %731 = vst [vmem:[#allocation10 + $0x20] sm:$0xff] %v709_v47  ;;  %v1069_v4 = vpop.f32.mrb[10].mxu0  ;;  %v1075_v5 = vpop.f32.mrb[10].mxu1 }
 0x3a7   :  { %v704_v6 = vadd.f32 %v1069_v4, %v754_v61  ;;  %v724_v7 = vadd.f32 %v1075_v5, %v754_v61  ;;  %v698_v8 = vpop.f32.mrb[11].mxu0  ;;  %v718_v49 = vpop.f32.mrb[11].mxu1 }
 0x3a8   :  { %v699_v9 = vadd.f32 %v754_v61, %v698_v8  ;;  %v719_v10 = vadd.f32 %v754_v61, %v718_v49 }
 0x3a9   :  { %730 = vst [vmem:[#allocation10 + $0x18] sm:$0xff] %v704_v6  ;;  %734 = vst [vmem:[#allocation10 + $0x38] sm:$0xff] %v724_v7 }
 0x3aa   :  { %729 = vst [vmem:[#allocation10 + $0x10] sm:$0xff] %v699_v9  ;;  %733 = vst [vmem:[#allocation10 + $0x30] sm:$0xff] %v719_v10 }
 0x3ab   :  { %1300 = shalt.err (!%p1297_p8)
}
 0x3ac   :  { %s1301_s14 = scalar_lea.hbm %s1560_s7, 1024 }
 0x3ad   :  { %p1302_p9 = scmp.ne.s32.totalorder %s1560_s7, %s1301_s14  ;;  %p1305_p10 = scmp.lt.u32.totalorder %s1301_s14, %s1560_s7 }
 0x3af   :  { %p1307_p11 = pnand %p1305_p10, %p1302_p9 }
 0x3b1   :  { %1310 = shalt.err (!%p1307_p11)
}
 0x3b2   :  { %746 = dma.vmem_to_hbm [thread:$0]  %s741_s9, 1024, %s1560_s7, [#allocation4], %s1323_s1, %s1323_s1, %s1324_s25  }
 0x3b3   :  { %1317 = dma.done.wait [#allocation4], 1024  }
 0x3b4   :  { %1318 = vsyncadd [#allocation4], 4294966272 }
 0x3b5   :  { %750 = vsyncpa [#allocation3], 1 }
 0x3b6   :  { %751 = vsyncpa [#allocation6], 1 }
 0x3b7   :  { %752 = vsyncpa [#allocation9], 1 }
 0x3b8   :  { %753 = vsyncpa [#allocation4], 1 }

</bundles_post_ra>
